<compile_context>
chip_gen: v5e
topology: v5e:2x2
jax: 0.10.0
libtpu: 0.0.40
codegen_flags: <defaults>
</compile_context>

<pallas_src>
import functools

import jax
import jax.numpy as jnp
from jax.experimental import pallas as pl
from jax.experimental.pallas import tpu as pltpu


def _round_up(a, m):
    return -(-a // m) * m


def _tefn_kernel(x_ref, w_ref, tw_ref, bb_ref, bp_ref, cw_ref, cb_ref, o_ref,
                 *, matmul_dtype):
    # x_ref : (T, Nblk)        packed input; column = one (batch, channel) pair
    # w_ref : (pred_len, T)    predict_linear weight (last pred_len rows only)
    # tw_ref: (pred_len, 1)    sum_f T_weight[l, f]
    # bb_ref: (pred_len, 1)    sum_f T_bias[l, f] + b[l] * sum_f T_weight[l, f]
    # bp_ref: (pred_len, 1)    predict_linear bias b[l]
    # cw_ref: (1, Nblk)        sum_f C_weight[c, f], tiled over batch (lane row)
    # cb_ref: (1, Nblk)        sum_f C_bias[c, f],   tiled over batch (lane row)
    # o_ref : (pred_len, Nblk)
    x = x_ref[...]

    # --- NormLayer.norm statistics (over time axis, unbiased=False) ---
    mean = jnp.mean(x, axis=0, keepdims=True)                # (1, Nblk)
    xc = x - mean
    var = jnp.mean(xc * xc, axis=0, keepdims=True)           # E[xc] == 0 analytically
    std = jnp.sqrt(var + 1e-5)

    # --- predict_linear on the *centered* (un-normalized) data ---
    # 1/std is per-column and commutes with the time contraction, so the
    # normalize/denorm scalings cancel on the matmul term: no divide needed.
    x2 = jnp.dot(w_ref[...].astype(matmul_dtype), xc.astype(matmul_dtype),
                 preferred_element_type=jnp.float32,
                 precision=jax.lax.Precision.HIGHEST)        # (pred_len, Nblk)

    # --- rank-1 reconstruction of the collapsed evidence slabs (in VMEM) ---
    cw = cw_ref[...]                                         # (1, Nblk)
    a = tw_ref[...] + cw                                     # (pred_len, Nblk)
    bias = bb_ref[...] + cb_ref[...] + bp_ref[...] * cw      # (pred_len, Nblk)

    # --- fused evidence sum + NormLayer.denorm ---
    o_ref[...] = x2 * a + bias * std + mean


def tefn_forward(x_enc, W, b, Tw, Tb, Cw, Cb, *, seq_len, pred_len,
                 lane_block=None, matmul_dtype=None):
    B, T, C = x_enc.shape
    assert T == seq_len
    L = pred_len + seq_len
    F = Tw.shape[1]
    assert W.shape == (L, T) and b.shape == (L,)
    assert Tw.shape == (L, F) and Tb.shape == (L, F)
    assert Cw.shape == (C, F) and Cb.shape == (C, F)

    x_enc = x_enc.astype(jnp.float32)
    if matmul_dtype is None:
        # bf16 MXU inputs once the contraction is long enough to amortize rounding
        matmul_dtype = jnp.bfloat16 if seq_len >= 64 else jnp.float32

    # ---- wrapper-side precompute: weight-only, O(L*F + C*F) ----
    # TODO(synk): hoist these (and Wp) out of the per-call path when weights are static.
    sTw = jnp.sum(Tw, axis=1)[seq_len:]                      # (pred_len,)
    sTb = jnp.sum(Tb, axis=1)[seq_len:]
    sCw = jnp.sum(Cw, axis=1)                                # (C,)
    sCb = jnp.sum(Cb, axis=1)
    Wp = W[seq_len:, :].astype(jnp.float32)                  # only rows we keep
    bp = b[seq_len:]
    tw_col = sTw[:, None].astype(jnp.float32)                # (pred_len, 1)
    bb_col = (sTb + bp * sTw)[:, None].astype(jnp.float32)   # (pred_len, 1)
    bp_col = bp[:, None].astype(jnp.float32)                 # (pred_len, 1)

    # ---- lane packing: columns are (batch, channel) pairs, col = b*C + c ----
    N = B * C
    if lane_block is None:
        lane_block = min(1024, _round_up(N, 128))
        # keep >= 2 grid steps when the lane axis allows it (megacore / v7x 2 TCs)
        if N > 128 and _round_up(N, 128) <= lane_block:
            lane_block = max(128, _round_up(_round_up(N, 128) // 2, 128))
    else:
        lane_block = _round_up(lane_block, 128)

    def working_set_bytes(lb):
        stream = 2 * 4 * (T * lb + 2 * lb + pred_len * lb)   # double-buffered x/rows/out
        resident = 4 * (pred_len * T + 3 * pred_len)         # W + columns
        temps = 4 * 3 * pred_len * lb                        # x2 / A / Bias live tiles
        return stream + resident + temps

    VMEM_BUDGET = 40 << 20          # conservative across v5e / v6e / v7x
    while working_set_bytes(lane_block) > VMEM_BUDGET and lane_block > 128:
        lane_block = max(128, _round_up(lane_block // 2, 128))

    num_blocks = pl.cdiv(N, lane_block)
    N_pad = num_blocks * lane_block

    # TODO(synk): for very large C (>= ~512) feed x_enc via a 3-D BlockSpec instead of
    # this transpose+reshape, avoiding an extra HBM round trip on the biggest tensor.
    x_packed = jnp.transpose(x_enc, (1, 0, 2)).reshape(T, N)     # (T, B*C)
    cw_row = jnp.tile(sCw, B)[None, :].astype(jnp.float32)       # (1, B*C)
    cb_row = jnp.tile(sCb, B)[None, :].astype(jnp.float32)
    if N_pad != N:
        pad = N_pad - N
        x_packed = jnp.pad(x_packed, ((0, 0), (0, pad)))
        cw_row = jnp.pad(cw_row, ((0, 0), (0, pad)))
        cb_row = jnp.pad(cb_row, ((0, 0), (0, pad)))

    cp_kwargs = dict(dimension_semantics=("parallel",))
    ws = working_set_bytes(lane_block)
    if ws > (12 << 20):             # would exceed v5e's 16 MiB default scoped VMEM
        cp_kwargs["vmem_limit_bytes"] = int(min(ws + (8 << 20), 48 << 20))

    kernel = functools.partial(_tefn_kernel, matmul_dtype=matmul_dtype)

    out = pl.pallas_call(
        kernel,
        out_shape=jax.ShapeDtypeStruct((pred_len, N_pad), jnp.float32),
        grid_spec=pltpu.PrefetchScalarGridSpec(
            num_scalar_prefetch=0,
            grid=(num_blocks,),
            in_specs=[
                pl.BlockSpec((T, lane_block), lambda g: (0, g)),         # x
                pl.BlockSpec((pred_len, T), lambda g: (0, 0)),           # W slice
                pl.BlockSpec((pred_len, 1), lambda g: (0, 0)),           # tw column
                pl.BlockSpec((pred_len, 1), lambda g: (0, 0)),           # bias column
                pl.BlockSpec((pred_len, 1), lambda g: (0, 0)),           # bp column
                pl.BlockSpec((1, lane_block), lambda g: (0, g)),         # cw lane row
                pl.BlockSpec((1, lane_block), lambda g: (0, g)),         # cb lane row
            ],
            out_specs=pl.BlockSpec((pred_len, lane_block), lambda g: (0, g)),
        ),
        compiler_params=pltpu.CompilerParams(**cp_kwargs),
    )(x_packed, Wp, tw_col, bb_col, bp_col, cw_row, cb_row)

    out = out[:, :N].reshape(pred_len, B, C)
    return jnp.transpose(out, (1, 0, 2))                    # (B, pred_len, C)


def tefn_reference(x_enc, W, b, Tw, Tb, Cw, Cb, *, seq_len, pred_len):
    """Pure-JAX reference mirroring the PyTorch forward (un-collapsed)."""
    x_enc = x_enc.astype(jnp.float32)
    mean = x_enc.mean(axis=1, keepdims=True)
    xc = x_enc - mean
    var = ((xc - xc.mean(axis=1, keepdims=True)) ** 2).mean(axis=1, keepdims=True)
    std = jnp.sqrt(var + 1e-5)
    xn = xc / std
    # predict_linear: Linear(seq_len, L) applied along time, per (b, c)
    x2 = jnp.einsum('btc,lt->blc', xn, W,
                    precision=jax.lax.Precision.HIGHEST) + b[None, :, None]
    t_out = x2[..., None] * Tw[None, :, None, :] + Tb[None, :, None, :]
    c_out = x2[..., None] * Cw[None, None, :, :] + Cb[None, None, :, :]
    fused = t_out + c_out
    out = fused.sum(-1)
    out = out * std + mean
    return out[:, -pred_len:, :]


if __name__ == "__main__":
    def make_inputs(key, B, seq_len, pred_len, enc_in, e_layers):
        L = pred_len + seq_len
        F = 2 ** e_layers
        k = jax.random.split(key, 7)
        x_enc = jax.random.normal(k[0], (B, seq_len, enc_in), jnp.float32)
        W = jax.random.normal(k[1], (L, seq_len), jnp.float32) * 0.1
        b = jax.random.normal(k[2], (L,), jnp.float32) * 0.1
        Tw = jax.random.normal(k[3], (L, F), jnp.float32)
        Tb = jax.random.normal(k[4], (L, F), jnp.float32)
        Cw = jax.random.normal(k[5], (enc_in, F), jnp.float32)
        Cb = jax.random.normal(k[6], (enc_in, F), jnp.float32)
        return x_enc, W, b, Tw, Tb, Cw, Cb

    key = jax.random.PRNGKey(0)
    k1, k2 = jax.random.split(key)

    # --- small config: single (padded) lane block ---
    B, seq_len, pred_len, enc_in, e_layers = 2, 8, 8, 4, 2
    args = make_inputs(k1, B, seq_len, pred_len, enc_in, e_layers)
    out = tefn_forward(*args, seq_len=seq_len, pred_len=pred_len)
    out = jax.block_until_ready(out)
    ref = tefn_reference(*args, seq_len=seq_len, pred_len=pred_len)
    assert out.shape == (B, pred_len, enc_in)
    err = float(jnp.max(jnp.abs(out - ref)))
    assert jnp.allclose(out, ref, rtol=1e-4, atol=1e-4), f"max abs err {err}"

    # --- larger config: 2 lane blocks, lane padding, realistic T ---
    B, seq_len, pred_len, enc_in, e_layers = 4, 96, 96, 96, 3
    args = make_inputs(k2, B, seq_len, pred_len, enc_in, e_layers)
    out = tefn_forward(*args, seq_len=seq_len, pred_len=pred_len,
                       matmul_dtype=jnp.float32)
    out = jax.block_until_ready(out)
    ref = tefn_reference(*args, seq_len=seq_len, pred_len=pred_len)
    assert out.shape == (B, pred_len, enc_in)
    err = float(jnp.max(jnp.abs(out - ref)))
    assert jnp.allclose(out, ref, rtol=1e-3, atol=1e-3), f"max abs err {err}"

    print("KERNEL_OK")
</pallas_src>

<mosaic_0001>
module attributes {stable_mosaic.version = 11 : i64} {
  func.func @_tefn_kernel(%arg0: i32, %arg1: memref<8x128xf32, #tpu.memory_space<vmem>>, %arg2: memref<8x8xf32, #tpu.memory_space<vmem>>, %arg3: memref<8x1xf32, #tpu.memory_space<vmem>>, %arg4: memref<8x1xf32, #tpu.memory_space<vmem>>, %arg5: memref<8x1xf32, #tpu.memory_space<vmem>>, %arg6: memref<1x128xf32, #tpu.memory_space<vmem>>, %arg7: memref<1x128xf32, #tpu.memory_space<vmem>>, %arg8: memref<8x128xf32, #tpu.memory_space<vmem>>) attributes {dimension_semantics = [#tpu.dimension_semantics<parallel>], iteration_bounds = array<i64: 1>, scalar_prefetch = 0 : i64, scratch_operands = 0 : i64, tpu.core_type = #tpu.core_type<tc>, window_params = [{transform_indices = @transform_0, window_bounds = array<i64: 8, 128>}, {pipeline_mode = #tpu.pipeline_mode<synchronous>, transform_indices = @transform_1, window_bounds = array<i64: 8, 8>}, {pipeline_mode = #tpu.pipeline_mode<synchronous>, transform_indices = @transform_2, window_bounds = array<i64: 8, 1>}, {pipeline_mode = #tpu.pipeline_mode<synchronous>, transform_indices = @transform_3, window_bounds = array<i64: 8, 1>}, {pipeline_mode = #tpu.pipeline_mode<synchronous>, transform_indices = @transform_4, window_bounds = array<i64: 8, 1>}, {transform_indices = @transform_5, window_bounds = array<i64: 1, 128>}, {transform_indices = @transform_6, window_bounds = array<i64: 1, 128>}, {transform_indices = @transform_7, window_bounds = array<i64: 8, 128>}]} {
    %c0 = arith.constant 0 : index
    %c0_0 = arith.constant 0 : index
    %0 = vector.load %arg1[%c0, %c0_0] : memref<8x128xf32, #tpu.memory_space<vmem>>, vector<8x128xf32>
    %cst = arith.constant dense<0.000000e+00> : vector<128xf32>
    %1 = vector.multi_reduction <add>, %0, %cst [0] : vector<8x128xf32> to vector<128xf32>
    %2 = vector.shape_cast %1 : vector<128xf32> to vector<1x128xf32>
    %cst_1 = arith.constant 8.000000e+00 : f32
    %3 = vector.broadcast %cst_1 : f32 to vector<1x128xf32>
    %4 = arith.divf %2, %3 : vector<1x128xf32>
    %5 = vector.broadcast %4 : vector<1x128xf32> to vector<8x128xf32>
    %6 = arith.subf %0, %5 : vector<8x128xf32>
    %7 = arith.mulf %6, %6 : vector<8x128xf32>
    %cst_2 = arith.constant dense<0.000000e+00> : vector<128xf32>
    %8 = vector.multi_reduction <add>, %7, %cst_2 [0] : vector<8x128xf32> to vector<128xf32>
    %9 = vector.shape_cast %8 : vector<128xf32> to vector<1x128xf32>
    %cst_3 = arith.constant 8.000000e+00 : f32
    %10 = vector.broadcast %cst_3 : f32 to vector<1x128xf32>
    %11 = arith.divf %9, %10 : vector<1x128xf32>
    %cst_4 = arith.constant 9.99999974E-6 : f32
    %12 = vector.broadcast %cst_4 : f32 to vector<1x128xf32>
    %13 = arith.addf %11, %12 : vector<1x128xf32>
    %14 = math.sqrt %13 : vector<1x128xf32>
    %c0_5 = arith.constant 0 : index
    %c0_6 = arith.constant 0 : index
    %15 = vector.load %arg2[%c0_5, %c0_6] : memref<8x8xf32, #tpu.memory_space<vmem>>, vector<8x8xf32>
    %cst_7 = arith.constant dense<0.000000e+00> : vector<8x128xf32>
    %16 = tpu.matmul %15, %6, %cst_7 {dimension_numbers = #tpu.dot_dimension_numbers<[1], [0], [0], [1], [0, 0, 1, 1], [], []>, precision = #tpu.contract_precision<fp32>} : vector<8x8xf32>, vector<8x128xf32>, vector<8x128xf32> -> vector<8x128xf32>
    %c0_8 = arith.constant 0 : index
    %c0_9 = arith.constant 0 : index
    %17 = vector.load %arg6[%c0_8, %c0_9] : memref<1x128xf32, #tpu.memory_space<vmem>>, vector<1x128xf32>
    %c0_10 = arith.constant 0 : index
    %c0_11 = arith.constant 0 : index
    %18 = vector.load %arg3[%c0_10, %c0_11] : memref<8x1xf32, #tpu.memory_space<vmem>>, vector<8x1xf32>
    %19 = vector.broadcast %18 : vector<8x1xf32> to vector<8x128xf32>
    %20 = vector.broadcast %17 : vector<1x128xf32> to vector<8x128xf32>
    %21 = arith.addf %19, %20 : vector<8x128xf32>
    %c0_12 = arith.constant 0 : index
    %c0_13 = arith.constant 0 : index
    %22 = vector.load %arg4[%c0_12, %c0_13] : memref<8x1xf32, #tpu.memory_space<vmem>>, vector<8x1xf32>
    %c0_14 = arith.constant 0 : index
    %c0_15 = arith.constant 0 : index
    %23 = vector.load %arg7[%c0_14, %c0_15] : memref<1x128xf32, #tpu.memory_space<vmem>>, vector<1x128xf32>
    %24 = vector.broadcast %22 : vector<8x1xf32> to vector<8x128xf32>
    %25 = vector.broadcast %23 : vector<1x128xf32> to vector<8x128xf32>
    %26 = arith.addf %24, %25 : vector<8x128xf32>
    %c0_16 = arith.constant 0 : index
    %c0_17 = arith.constant 0 : index
    %27 = vector.load %arg5[%c0_16, %c0_17] : memref<8x1xf32, #tpu.memory_space<vmem>>, vector<8x1xf32>
    %28 = vector.broadcast %27 : vector<8x1xf32> to vector<8x128xf32>
    %29 = vector.broadcast %17 : vector<1x128xf32> to vector<8x128xf32>
    %30 = arith.mulf %28, %29 : vector<8x128xf32>
    %31 = arith.addf %26, %30 : vector<8x128xf32>
    %32 = arith.mulf %16, %21 : vector<8x128xf32>
    %33 = vector.broadcast %14 : vector<1x128xf32> to vector<8x128xf32>
    %34 = arith.mulf %31, %33 : vector<8x128xf32>
    %35 = arith.addf %32, %34 : vector<8x128xf32>
    %36 = vector.broadcast %4 : vector<1x128xf32> to vector<8x128xf32>
    %37 = arith.addf %35, %36 : vector<8x128xf32>
    %c0_18 = arith.constant 0 : index
    %c0_19 = arith.constant 0 : index
    %38 = vector.load %arg8[%c0_18, %c0_19] : memref<8x128xf32, #tpu.memory_space<vmem>>, vector<8x128xf32>
    tpu.vector_store %arg8[%c0_18, %c0_19], %37 {strides = array<i32>} : memref<8x128xf32, #tpu.memory_space<vmem>>, vector<8x128xf32>,
    return
  }
  func.func @transform_0(%arg0: i32) -> (i32, i32) {
    %c0_i32 = arith.constant 0 : i32
    %c0_i32_0 = arith.constant 0 : i32
    return %c0_i32, %arg0 : i32, i32
  }
  func.func @transform_1(%arg0: i32) -> (i32, i32) {
    %c0_i32 = arith.constant 0 : i32
    %c0_i32_0 = arith.constant 0 : i32
    %c0_i32_1 = arith.constant 0 : i32
    return %c0_i32, %c0_i32_0 : i32, i32
  }
  func.func @transform_2(%arg0: i32) -> (i32, i32) {
    %c0_i32 = arith.constant 0 : i32
    %c0_i32_0 = arith.constant 0 : i32
    %c0_i32_1 = arith.constant 0 : i32
    return %c0_i32, %c0_i32_0 : i32, i32
  }
  func.func @transform_3(%arg0: i32) -> (i32, i32) {
    %c0_i32 = arith.constant 0 : i32
    %c0_i32_0 = arith.constant 0 : i32
    %c0_i32_1 = arith.constant 0 : i32
    return %c0_i32, %c0_i32_0 : i32, i32
  }
  func.func @transform_4(%arg0: i32) -> (i32, i32) {
    %c0_i32 = arith.constant 0 : i32
    %c0_i32_0 = arith.constant 0 : i32
    %c0_i32_1 = arith.constant 0 : i32
    return %c0_i32, %c0_i32_0 : i32, i32
  }
  func.func @transform_5(%arg0: i32) -> (i32, i32) {
    %c0_i32 = arith.constant 0 : i32
    %c0_i32_0 = arith.constant 0 : i32
    return %c0_i32, %arg0 : i32, i32
  }
  func.func @transform_6(%arg0: i32) -> (i32, i32) {
    %c0_i32 = arith.constant 0 : i32
    %c0_i32_0 = arith.constant 0 : i32
    return %c0_i32, %arg0 : i32, i32
  }
  func.func @transform_7(%arg0: i32) -> (i32, i32) {
    %c0_i32 = arith.constant 0 : i32
    %c0_i32_0 = arith.constant 0 : i32
    return %c0_i32, %arg0 : i32, i32
  }
}

</mosaic_0001>

<bundles_post_ra>
// kernel: tpu_custom_call.1
= control target key start
LH: loop header
LB: loop body
LE: loop exit
PB: predicated region body
PF: predicated region fallthrough
CT: control target
= control target key end

     0   :  { %vm65_vm0 = vcmask 64512   ;;  %v303_v4 = vmov 8.0   ;;  %v304_v6 = vmov 0   ;;  %s374_s0 = inlined_call_operand.vmem [shape: f32[8,128], index: 0, kind: input, shape index: {}]   ;;  %s375_s1 = inlined_call_operand.vmem [shape: f32[8,8], index: 1, kind: input, shape index: {}]   ;;  %s376_s2 = inlined_call_operand.vmem [shape: f32[8,1], index: 2, kind: input, shape index: {}]   ;;  %s377_s3 = inlined_call_operand.vmem [shape: f32[8,1], index: 3, kind: input, shape index: {}]   ;;  %s378_s4 = inlined_call_operand.vmem [shape: f32[8,1], index: 4, kind: input, shape index: {}]   ;;  %s379_s5 = inlined_call_operand.vmem [shape: f32[1,128], index: 5, kind: input, shape index: {}]   ;;  %s380_s6 = inlined_call_operand.vmem [shape: f32[1,128], index: 6, kind: input, shape index: {}]   ;;  %s381_s7 = inlined_call_operand.hbm [shape: f32[8,128], index: 7, kind: output, shape index: {}]  }
   0x1   :  { %v27_v0 = vld [vmem:[%s374_s0] sm:$0xff]  ;;  %273 = vrcp.f32 %v303_v4  ;;  %269 = vset.pattern.permute.xlu0 %v304_v6  ;;  %270 = vset.pattern.permute.xlu1 %v304_v6 }
   0x2   :  { %v64_v1 = vld [vmem:[%s375_s1] sm:$0xff]  ;;  %v28_v3 = vrot.slane %v27_v0, 4 }
   0x3   :  { %v226_v2 = vld [vmem:[%s377_s3] sm:$0xff]  ;;  %v67_v5 = vsel %vm65_vm0, %v64_v1, 0 }
   0x4   :  { %230 = vperm.xlu0 %269, %v226_v2  }
   0x5   :  { %12 = vsyncpa [#allocation3], 0  ;;  %v29_v7 = vadd.f32 %v28_v3, %v27_v0  ;;  %v86_v8 = vand.u32 4294901760, %v67_v5  ;;  %v237_v14 = vld [vmem:[%s378_s4] sm:$0xff]  ;;  %s257_s12 = sshll.u32 %s381_s7, 4  ;;  %s258_s12 = int_to_ptr.hbm [resolvable:$true] %s257_s12 }
   0x6   :  { %v216_v15 = vld [vmem:[%s376_s2] sm:$0xff] }
   0x7   :  { %v30_v9 = vrot.slane %v29_v7, 2  ;;  %v274_v10 = vpop.eup %273  ;;  %v87_v13 = vsub.f32 %v67_v5, %v86_v8  ;;  %219 = vperm.xlu1 %270, %v216_v15   ;;  %v271_v49 = vld [vmem:[%s380_s6] ss:$0 sm:$0xff] }
   0x8   :  { %v35_v12 = vmul.f32 8.0, %v274_v10  ;;  %vm39_vm1 = vweird.f32 %v274_v10  ;;  %v272_v51 = vld [vmem:[%s379_s5] ss:$0 sm:$0xff]  ;;  %s305_s5 = smov [#allocation2]  }
   0x9   :  { %v31_v11 = vadd.f32 %v30_v9, %v29_v7  ;;  %v88_v19 = vand.u32 4294901760, %v87_v13  ;;  %s255_s6 = sshll.u32 %s305_s5, 4  ;;  %s256_s6 = int_to_ptr.vmem [resolvable:$true] %s255_s6 }
   0xa   :  { %v36_v17 = vsub.f32 1.0, %v35_v12 }
   0xb   :  { %v32_v16 = vrot.slane %v31_v11, 1  ;;  %v89_v23 = vsub.f32 %v87_v13, %v88_v19 }
   0xc   :  { %240 = vperm.xlu0 %269, %v237_v14   ;;  %v37_v18 = vmul.f32 %v274_v10, %v36_v17 }
   0xd   :  { %v33_v20 = vadd.f32 %v32_v16, %v31_v11  ;;  %v90_v26 = vand.u32 4294901760, %v89_v23 }
   0xe   :  { %v38_v21 = vadd.f32 %v274_v10, %v37_v18 }
  0x10   :  { %v40_v22 = vsel %vm39_vm1, %v274_v10, %v38_v21 }
  0x11   :  { %v361_v24 = vmul.f32 %v40_v22, %v33_v20 }
  0x13   :  { %v42_v25 = vsub.f32 %v27_v0, %v361_v24 }
  0x15   :  { %v43_v27 = vmul.f32 %v42_v25, %v42_v25  ;;  %v84_v28 = vand.u32 4294901760, %v42_v25 }
  0x17   :  { %v44_v29 = vrot.slane %v43_v27, 4  ;;  %v111_v30 = vsub.f32 %v42_v25, %v84_v28  ;;  %85 = vmatpush.msra.mxu0 %v84_v28  ;;  %161 = vmatpush.msra.mxu3 %v84_v28 }
  0x18   :  { %91 = vmatmul.f32.vlgmr.msra.gmra.mxu0 %v90_v26  ;;  %165 = vmatmul.f32.vlgmr.msra.gmra.mxu3 %v88_v19 }
  0x19   :  { %v45_v31 = vadd.f32 %v44_v29, %v43_v27  ;;  %138 = vmatpush.msra.mxu2 %v111_v30  ;;  %v112_v32 = vand.u32 4294901760, %v111_v30 }
  0x1a   :  { %141 = vmatmul.f32.vlgmr.msra.gmra.mxu2 %v87_v13 }
  0x1b   :  { %v46_v33 = vrot.slane %v45_v31, 2  ;;  %187 = vmatpush.msrb.mxu0 %v112_v32  ;;  %v113_v34 = vsub.f32 %v111_v30, %v112_v32 }
  0x1d   :  { %v47_v35 = vadd.f32 %v46_v33, %v45_v31  ;;  %v114_v36 = vand.u32 4294901760, %v113_v34 }
  0x1f   :  { %v48_v37 = vrot.slane %v47_v35, 1  ;;  %115 = vmatpush.msra.mxu1 %v114_v36 }
  0x20   :  { %117 = vmatmul.f32.vlgmr.msra.gmra.mxu1 %v86_v8  ;;  %189 = vmatmul.f32.vlgmr.msrb.gmra.mxu0 %v86_v8 }
  0x21   :  { %v49_v38 = vadd.f32 %v48_v37, %v47_v35  ;;  %209 = vmatpush.msrb.mxu1 %v84_v28 }
  0x23   :  { %v50_v39 = vmul.f32 %v49_v38, %v40_v22 }
  0x25   :  { %v51_v40 = vadd.f32 1e-05, %v50_v39 }
  0x27   :  { %275 = vrsqrt.f32 %v51_v40  ;;  %vm59_vm2 = vcmp.eq.f32.partialorder %v51_v40, inf  ;;  %v62_v60 = vand.u32 2147483648, %v51_v40  ;;  %vm61_vm3 = vcmp.eq.f32.partialorder %v51_v40, 0.0 }
  0x28   :  { %211 = vmatmul.f32.vlgmr.msrb.gmra.mxu1 %v86_v8 }
  0x2d   :  { %v276_v41 = vpop.eup %275 }
  0x2e   :  { %v53_v42 = vmul.f32 %v276_v41, %v51_v40 }
  0x30   :  { %v54_v43 = vmul.f32 %v276_v41, %v53_v42 }
  0x32   :  { %v55_v45 = vmul.f32 0.5, %v54_v43 }
  0x34   :  { %v56_v46 = vsub.f32 1.5, %v55_v45 }
  0x36   :  { %v57_v48 = vmul.f32 %v276_v41, %v56_v46 }
  0x38   :  { %v58_v54 = vmul.f32 %v57_v48, %v51_v40 }
  0x3a   :  { %v60_v63 = vsel %vm59_vm2, %v51_v40, %v58_v54 }
  0x3b   :  { %v63_v4 = vsel %vm61_vm3, %v62_v60, %v60_v63 }
  0x76   :  { %v231_v44 = vpop.permute.xlu0 %230 }
  0x77   :  { %v236_v57 = vadd.f32 %v271_v49, %v231_v44 }
  0x79   :  { %v220_v62 = vpop.permute.xlu1 %219 }
  0x7a   :  { %v225_v3 = vadd.f32 %v272_v51, %v220_v62 }
  0x7e   :  { %v241_v50 = vpop.permute.xlu0 %240 }
  0x7f   :  { %v243_v58 = vmul.f32 %v272_v51, %v241_v50 }
  0x81   :  { %v244_v1 = vadd.f32 %v243_v58, %v236_v57 }
  0x83   :  { %v246_v7 = vmul.f32 %v244_v1, %v63_v4 }
  0x95   :  { %v92_v47 = vpop.f32.mrf.mxu0 }
  0x9b   :  { %v166_v56 = vpop.f32.mrf.mxu3 }
  0x9d   :  { %v118_v52 = vpop.f32.mrf.mxu1  ;;  %v142_v53 = vpop.f32.mrf.mxu2 }
  0x9e   :  { %v119_v55 = vadd.f32 %v118_v52, %v92_v47  ;;  %v190_v61 = vpop.f32.mrf.mxu0 }
  0xa0   :  { %v143_v59 = vadd.f32 %v142_v53, %v119_v55 }
  0xa2   :  { %v167_v0 = vadd.f32 %v166_v56, %v143_v59 }
  0xa4   :  { %v191_v2 = vadd.f32 %v190_v61, %v167_v0 }
  0xa5   :  { %v212_v5 = vpop.f32.mrf.mxu1 }
  0xa6   :  { %v213_v6 = vadd.f32 %v212_v5, %v191_v2 }
  0xa8   :  { %v245_v8 = vmul.f32 %v225_v3, %v213_v6 }
  0xaa   :  { %v247_v9 = vadd.f32 %v246_v7, %v245_v8 }
  0xac   :  { %v248_v10 = vadd.f32 %v247_v9, %v361_v24 }
  0xae   :  { %249 = vst [vmem:[#allocation2] sm:$0xff] %v248_v10 }
  0xaf   :  { %260 = dma.vmem_to_hbm [thread:$0]  %s256_s6, 128, %s258_s12, [#allocation3]  }
  0xb0   :  { %301 = dma.done.wait [#allocation3], 128  }
  0xb1   :  { %302 = vsyncadd [#allocation3], 4294967168 }
  0xb2   :  { %265 = vsyncpa [#allocation3], 1 }

</bundles_post_ra>
